<compile_context>
chip_gen: v7x
topology: tpu7x:2x2x1
jax: 0.10.0
libtpu: 0.0.40
codegen_flags: <defaults>
</compile_context>

<pallas_src>
import functools

import jax
import jax.numpy as jnp
from jax import lax
from jax.experimental import pallas as pl
from jax.experimental.pallas import tpu as pltpu

_BN_EPS = 1e-5
# Safe scoped-VMEM budget on v5e / v6e / v7x.  Could be raised to 64-96 MiB on
# v6e (128 MiB physical) for larger spatial tiles; keep <=48 MiB on v7x.
_VMEM_LIMIT = 32 * 1024 * 1024


def _conv3x3_accum(pp, w2_ref):
    """3x3 'same' conv of one (already spatially padded) image.

    pp     : (H2+2, W2+2, Cin) mxu_dtype  (zero-padded in the wrapper)
    w2_ref : Ref of shape (9, Cin, Coutp) mxu_dtype, taps ordered (kh, kw)
    returns: (H2*W2, Coutp) float32

    Never materializes the 9x im2col buffer: 9 shifted matmuls accumulated in
    f32 (extra MXU pushes are nearly free; the 9x lane concatenate is not).
    """
    H2 = pp.shape[0] - 2
    W2 = pp.shape[1] - 2
    cin = pp.shape[2]
    acc = None
    t = 0
    for di in range(3):
        for dj in range(3):
            win = pp[di:di + H2, dj:dj + W2, :].reshape(H2 * W2, cin)
            d = jnp.dot(win, w2_ref[t], preferred_element_type=jnp.float32)
            acc = d if acc is None else acc + d
            t += 1
    return acc


def _stats_kernel(pooled_ref, w2_ref, conv_ref, mean_ref, m2_ref,
                  *, n_pix, store_dtype):
    """Pass 1: conv3x3 (bias-free) -> write conv map; Welford per-channel stats."""
    b = pl.program_id(1)                       # step within this core's chunk
    pp = pooled_ref[0]                         # (H2+2, W2+2, Cin)

    conv = _conv3x3_accum(pp, w2_ref)          # (H2*W2, Coutp) f32
    conv_q = conv.astype(store_dtype)
    conv_ref[0] = conv_q                       # lane-dense store (Coutp % 128 == 0)

    # Stats from the stored (possibly bf16-quantized) values so pass 2 sees the
    # exact same numbers the statistics were computed from.
    conv_s = conv_q.astype(jnp.float32)
    mean_b = jnp.mean(conv_s, axis=0, keepdims=True)               # (1, Coutp)
    m2_b = jnp.sum((conv_s - mean_b) ** 2, axis=0, keepdims=True)  # (1, Coutp)

    @pl.when(b == 0)
    def _():
        mean_ref[...] = jnp.zeros_like(mean_ref)
        m2_ref[...] = jnp.zeros_like(m2_ref)

    # Chan / Welford combine of (mean_b, m2_b, n_pix) into the running
    # (mean, M2) for this core's chunk.  Per-step counts are equal (n_pix).
    bf = b.astype(jnp.float32)
    inv = 1.0 / (bf + 1.0)
    m_old = mean_ref[0]                        # (1, Coutp)
    v_old = m2_ref[0]
    delta = mean_b - m_old
    mean_ref[0] = m_old + delta * inv
    m2_ref[0] = v_old + m2_b + delta * delta * (jnp.float32(n_pix) * bf * inv)


def _main_kernel(pooled_ref, conv_ref, w1_ref, b1_ref, scale_ref, shift_ref,
                 out_ref):
    """Pass 2: 1x1 residual conv + folded-BN FMA + ReLU + add.  No conv recompute."""
    pp = pooled_ref[0]                         # (H2+2, W2+2, Cin)
    H2 = pp.shape[0] - 2
    W2 = pp.shape[1] - 2
    cin = pp.shape[2]

    # resblock: 1x1 conv == channel matmul on the MXU (interior of padded pp).
    x = pp[1:1 + H2, 1:1 + W2, :].reshape(H2 * W2, cin)
    res = jnp.dot(x, w1_ref[...], preferred_element_type=jnp.float32) + b1_ref[...]

    # BatchNorm folded into one FMA, then ReLU, then residual add.
    conv = conv_ref[0].astype(jnp.float32)     # (H2*W2, Coutp)
    bn = conv * scale_ref[...] + shift_ref[...]
    out_ref[0] = res + jnp.maximum(bn, 0.0)    # lane-dense store


def encoder_block_forward(x_nchw, params, down=True, mxu_dtype=jnp.bfloat16):
    """Pallas forward pass. x_nchw: (B, Cin, H, W) float32 (PyTorch layout).

    mxu_dtype: dtype fed to the MXU matmuls and used for the pooled / conv-map
    HBM intermediates (accumulation is always f32).  bfloat16 is the fast path
    on v6e/v7x; use jnp.float32 for bit-accurate validation.
    """
    B, Cin, H, W = x_nchw.shape
    Cout = params["w1"].shape[0]
    Coutp = ((Cout + 127) // 128) * 128        # lane-dense padded channel count

    x_nhwc = jnp.transpose(x_nchw, (0, 2, 3, 1)).astype(jnp.float32)
    if down:
        H2, W2 = H // 2, W // 2                # nn.MaxPool2d(2): assumes even H, W
        pooled = jnp.max(x_nhwc.reshape(B, H2, 2, W2, 2, Cin), axis=(2, 4))
    else:
        H2, W2 = H, W
        pooled = x_nhwc
    n_pix = H2 * W2

    # Spatial zero padding (padding=1) + MXU-dtype cast done once, in XLA,
    # fused with the transpose/maxpool above.
    pooled_p = jnp.pad(pooled, ((0, 0), (1, 1), (1, 1), (0, 0))).astype(mxu_dtype)

    # Re-layout PyTorch-convention weights, padded to Coutp output channels.
    w1_t = jnp.transpose(params["w1"][:, :, 0, 0], (1, 0)).astype(mxu_dtype)   # (Cin, Cout)
    w1k = jnp.zeros((Cin, Coutp), mxu_dtype).at[:, :Cout].set(w1_t)
    w2_t = jnp.transpose(params["w2"], (2, 3, 1, 0)).reshape(9, Cin, Cout)     # (kh,kw,ci,co)
    w2k = jnp.zeros((9, Cin, Coutp), mxu_dtype).at[:, :, :Cout].set(w2_t.astype(mxu_dtype))
    b1k = jnp.zeros((1, Coutp), jnp.float32).at[0, :Cout].set(params["b1"].astype(jnp.float32))
    gamma = jnp.zeros((Coutp,), jnp.float32).at[:Cout].set(params["gamma"].astype(jnp.float32))
    beta = jnp.zeros((Coutp,), jnp.float32).at[:Cout].set(params["beta"].astype(jnp.float32))
    # NOTE: conv2's bias b2 is exactly cancelled by the BN mean subtraction and
    # is intentionally unused.

    store_dtype = mxu_dtype                    # dtype of the saved conv map

    # Split the batch across two partial accumulators so v7x's two TensorCores
    # both work on the stats pass (no effect on 1-TC v5e/v6e).
    n_split = 2 if (B % 2 == 0 and B >= 2) else 1
    bpc = B // n_split

    # ---- pass 1: conv map + Welford BN statistics -------------------------
    conv_map, means, m2s = pl.pallas_call(
        functools.partial(_stats_kernel, n_pix=n_pix, store_dtype=store_dtype),
        out_shape=(
            jax.ShapeDtypeStruct((B, n_pix, Coutp), store_dtype),
            jax.ShapeDtypeStruct((n_split, 1, Coutp), jnp.float32),
            jax.ShapeDtypeStruct((n_split, 1, Coutp), jnp.float32),
        ),
        grid_spec=pltpu.PrefetchScalarGridSpec(
            num_scalar_prefetch=0,
            grid=(n_split, bpc),
            in_specs=[
                pl.BlockSpec((1, H2 + 2, W2 + 2, Cin),
                             lambda c, b: (c * bpc + b, 0, 0, 0)),
                pl.BlockSpec((9, Cin, Coutp), lambda c, b: (0, 0, 0)),
            ],
            out_specs=[
                pl.BlockSpec((1, n_pix, Coutp), lambda c, b: (c * bpc + b, 0, 0)),
                pl.BlockSpec((1, 1, Coutp), lambda c, b: (c, 0, 0)),
                pl.BlockSpec((1, 1, Coutp), lambda c, b: (c, 0, 0)),
            ],
        ),
        compiler_params=pltpu.CompilerParams(
            dimension_semantics=("parallel", "arbitrary"),
            vmem_limit_bytes=_VMEM_LIMIT),
    )(pooled_p, w2k)

    # Merge the per-core (mean, M2) partials (equal counts) and fold BN into a
    # single per-channel scale / shift (tiny XLA op).
    means2 = means[:, 0, :]                    # (n_split, Coutp)
    m2s2 = m2s[:, 0, :]
    cnt = bpc * n_pix
    n_total = B * n_pix
    mean_tot = jnp.mean(means2, axis=0)
    m2_tot = jnp.sum(m2s2, axis=0) + cnt * jnp.sum((means2 - mean_tot) ** 2, axis=0)
    var = m2_tot / n_total                     # biased variance, as BatchNorm uses
    scale = gamma * lax.rsqrt(var + _BN_EPS)
    shift = beta - mean_tot * scale

    # ---- pass 2: folded BN + ReLU + 1x1 residual, one image per step ------
    out = pl.pallas_call(
        _main_kernel,
        out_shape=jax.ShapeDtypeStruct((B, n_pix, Coutp), jnp.float32),
        grid_spec=pltpu.PrefetchScalarGridSpec(
            num_scalar_prefetch=0,
            grid=(B,),
            in_specs=[
                pl.BlockSpec((1, H2 + 2, W2 + 2, Cin), lambda b: (b, 0, 0, 0)),
                pl.BlockSpec((1, n_pix, Coutp), lambda b: (b, 0, 0)),
                pl.BlockSpec((Cin, Coutp), lambda b: (0, 0)),
                pl.BlockSpec((1, Coutp), lambda b: (0, 0)),
                pl.BlockSpec((1, Coutp), lambda b: (0, 0)),
                pl.BlockSpec((1, Coutp), lambda b: (0, 0)),
            ],
            out_specs=pl.BlockSpec((1, n_pix, Coutp), lambda b: (b, 0, 0)),
        ),
        compiler_params=pltpu.CompilerParams(
            dimension_semantics=("parallel",),
            vmem_limit_bytes=_VMEM_LIMIT),
    )(pooled_p, conv_map, w1k, b1k, scale[None, :], shift[None, :])

    # Strip the channel padding and restore the PyTorch NCHW layout.
    out = out[:, :, :Cout].reshape(B, H2, W2, Cout)
    return jnp.transpose(out, (0, 3, 1, 2))


def encoder_block_reference(x, params, down=True):
    """Pure-JAX reference mirroring the PyTorch forward (for validation)."""
    if down:
        x = lax.reduce_window(x, -jnp.inf, lax.max,
                              (1, 1, 2, 2), (1, 1, 2, 2), "VALID")
    dn = ("NCHW", "OIHW", "NCHW")
    res = lax.conv_general_dilated(x, params["w1"], (1, 1), "VALID",
                                   dimension_numbers=dn,
                                   precision=lax.Precision.HIGHEST)
    res = res + params["b1"][None, :, None, None]
    conv = lax.conv_general_dilated(x, params["w2"], (1, 1), ((1, 1), (1, 1)),
                                    dimension_numbers=dn,
                                    precision=lax.Precision.HIGHEST)
    conv = conv + params["b2"][None, :, None, None]
    mean = jnp.mean(conv, axis=(0, 2, 3), keepdims=True)
    var = jnp.mean((conv - mean) ** 2, axis=(0, 2, 3), keepdims=True)
    bn = (conv - mean) * lax.rsqrt(var + _BN_EPS)
    bn = bn * params["gamma"][None, :, None, None] + params["beta"][None, :, None, None]
    return res + jnp.maximum(bn, 0.0)


if __name__ == "__main__":
    key = jax.random.PRNGKey(0)
    B, Cin, Cout, H, W = 2, 4, 8, 16, 16
    ks = jax.random.split(key, 7)

    x = jax.random.normal(ks[0], (B, Cin, H, W), jnp.float32)
    params = {
        "w1": 0.5 * jax.random.normal(ks[1], (Cout, Cin, 1, 1), jnp.float32),
        "b1": 0.1 * jax.random.normal(ks[2], (Cout,), jnp.float32),
        "w2": 0.2 * jax.random.normal(ks[3], (Cout, Cin, 3, 3), jnp.float32),
        "b2": 0.1 * jax.random.normal(ks[4], (Cout,), jnp.float32),
        "gamma": 1.0 + 0.1 * jax.random.normal(ks[5], (Cout,), jnp.float32),
        "beta": 0.1 * jax.random.normal(ks[6], (Cout,), jnp.float32),
    }

    ref = encoder_block_reference(x, params, down=True)

    # f32 MXU path: tight check of the kernel structure.
    out_f32 = jax.block_until_ready(
        encoder_block_forward(x, params, down=True, mxu_dtype=jnp.float32))
    assert out_f32.shape == (B, Cout, H // 2, W // 2), out_f32.shape
    if not jnp.allclose(out_f32, ref, atol=1e-2, rtol=1e-2):
        max_err = float(jnp.max(jnp.abs(out_f32 - ref)))
        raise SystemExit(f"f32 mismatch vs reference, max abs err = {max_err}")

    # bf16 MXU path (default / fast path on v6e & v7x): looser tolerance
    # (pooled map, conv map and MXU operands are bf16-quantized).
    out_bf16 = jax.block_until_ready(
        encoder_block_forward(x, params, down=True, mxu_dtype=jnp.bfloat16))
    assert out_bf16.shape == (B, Cout, H // 2, W // 2), out_bf16.shape
    if not jnp.allclose(out_bf16, ref, atol=5e-2, rtol=5e-2):
        max_err = float(jnp.max(jnp.abs(out_bf16 - ref)))
        raise SystemExit(f"bf16 mismatch vs reference, max abs err = {max_err}")

    print("KERNEL_OK")
</pallas_src>

<mosaic_0001>
module attributes {stable_mosaic.version = 11 : i64} {
  func.func @_stats_kernel(%arg0: i32, %arg1: i32, %arg2: memref<1x10x10x4xf32, #tpu.memory_space<vmem>>, %arg3: memref<9x4x128xf32, #tpu.memory_space<vmem>>, %arg4: memref<1x64x128xf32, #tpu.memory_space<vmem>>, %arg5: memref<1x1x128xf32, #tpu.memory_space<vmem>>, %arg6: memref<1x1x128xf32, #tpu.memory_space<vmem>>) attributes {dimension_semantics = [#tpu.dimension_semantics<parallel>, #tpu.dimension_semantics<arbitrary>], iteration_bounds = array<i64: 2, 1>, scalar_prefetch = 0 : i64, scratch_operands = 0 : i64, tpu.core_type = #tpu.core_type<tc>, window_params = [{transform_indices = @transform_0, window_bounds = array<i64: 1, 10, 10, 4>}, {pipeline_mode = #tpu.pipeline_mode<synchronous>, transform_indices = @transform_1, window_bounds = array<i64: 9, 4, 128>}, {transform_indices = @transform_2, window_bounds = array<i64: 1, 64, 128>}, {transform_indices = @transform_3, window_bounds = array<i64: 1, 1, 128>}, {transform_indices = @transform_4, window_bounds = array<i64: 1, 1, 128>}]} {
    %c0 = arith.constant 0 : index
    %c0_0 = arith.constant 0 : index
    %c0_1 = arith.constant 0 : index
    %c0_2 = arith.constant 0 : index
    %0 = vector.load %arg2[%c0, %c0_0, %c0_1, %c0_2] : memref<1x10x10x4xf32, #tpu.memory_space<vmem>>, vector<1x10x10x4xf32>
    %1 = vector.shape_cast %0 : vector<1x10x10x4xf32> to vector<10x10x4xf32>
    %2 = vector.extract_strided_slice %1 {offsets = [0, 0, 0], sizes = [8, 8, 4], strides = [1, 1, 1]} : vector<10x10x4xf32> to vector<8x8x4xf32>
    %3 = vector.shape_cast %2 : vector<8x8x4xf32> to vector<64x4xf32>
    %c0_3 = arith.constant 0 : index
    %c0_4 = arith.constant 0 : index
    %c0_5 = arith.constant 0 : index
    %4 = vector.load %arg3[%c0_3, %c0_4, %c0_5] : memref<9x4x128xf32, #tpu.memory_space<vmem>>, vector<1x4x128xf32>
    %5 = vector.shape_cast %4 : vector<1x4x128xf32> to vector<4x128xf32>
    %cst = arith.constant dense<0.000000e+00> : vector<64x128xf32>
    %6 = tpu.matmul %3, %5, %cst {dimension_numbers = #tpu.dot_dimension_numbers<[1], [0], [0], [1], [0, 0, 1, 1], [], []>} : vector<64x4xf32>, vector<4x128xf32>, vector<64x128xf32> -> vector<64x128xf32>
    %7 = vector.extract_strided_slice %1 {offsets = [0, 1, 0], sizes = [8, 8, 4], strides = [1, 1, 1]} : vector<10x10x4xf32> to vector<8x8x4xf32>
    %8 = vector.shape_cast %7 : vector<8x8x4xf32> to vector<64x4xf32>
    %c1 = arith.constant 1 : index
    %c0_6 = arith.constant 0 : index
    %c0_7 = arith.constant 0 : index
    %9 = vector.load %arg3[%c1, %c0_6, %c0_7] : memref<9x4x128xf32, #tpu.memory_space<vmem>>, vector<1x4x128xf32>
    %10 = vector.shape_cast %9 : vector<1x4x128xf32> to vector<4x128xf32>
    %cst_8 = arith.constant dense<0.000000e+00> : vector<64x128xf32>
    %11 = tpu.matmul %8, %10, %cst_8 {dimension_numbers = #tpu.dot_dimension_numbers<[1], [0], [0], [1], [0, 0, 1, 1], [], []>} : vector<64x4xf32>, vector<4x128xf32>, vector<64x128xf32> -> vector<64x128xf32>
    %12 = arith.addf %6, %11 : vector<64x128xf32>
    %13 = vector.extract_strided_slice %1 {offsets = [0, 2, 0], sizes = [8, 8, 4], strides = [1, 1, 1]} : vector<10x10x4xf32> to vector<8x8x4xf32>
    %14 = vector.shape_cast %13 : vector<8x8x4xf32> to vector<64x4xf32>
    %c2 = arith.constant 2 : index
    %c0_9 = arith.constant 0 : index
    %c0_10 = arith.constant 0 : index
    %15 = vector.load %arg3[%c2, %c0_9, %c0_10] : memref<9x4x128xf32, #tpu.memory_space<vmem>>, vector<1x4x128xf32>
    %16 = vector.shape_cast %15 : vector<1x4x128xf32> to vector<4x128xf32>
    %cst_11 = arith.constant dense<0.000000e+00> : vector<64x128xf32>
    %17 = tpu.matmul %14, %16, %cst_11 {dimension_numbers = #tpu.dot_dimension_numbers<[1], [0], [0], [1], [0, 0, 1, 1], [], []>} : vector<64x4xf32>, vector<4x128xf32>, vector<64x128xf32> -> vector<64x128xf32>
    %18 = arith.addf %12, %17 : vector<64x128xf32>
    %19 = vector.extract_strided_slice %1 {offsets = [1, 0, 0], sizes = [8, 8, 4], strides = [1, 1, 1]} : vector<10x10x4xf32> to vector<8x8x4xf32>
    %20 = vector.shape_cast %19 : vector<8x8x4xf32> to vector<64x4xf32>
    %c3 = arith.constant 3 : index
    %c0_12 = arith.constant 0 : index
    %c0_13 = arith.constant 0 : index
    %21 = vector.load %arg3[%c3, %c0_12, %c0_13] : memref<9x4x128xf32, #tpu.memory_space<vmem>>, vector<1x4x128xf32>
    %22 = vector.shape_cast %21 : vector<1x4x128xf32> to vector<4x128xf32>
    %cst_14 = arith.constant dense<0.000000e+00> : vector<64x128xf32>
    %23 = tpu.matmul %20, %22, %cst_14 {dimension_numbers = #tpu.dot_dimension_numbers<[1], [0], [0], [1], [0, 0, 1, 1], [], []>} : vector<64x4xf32>, vector<4x128xf32>, vector<64x128xf32> -> vector<64x128xf32>
    %24 = arith.addf %18, %23 : vector<64x128xf32>
    %25 = vector.extract_strided_slice %1 {offsets = [1, 1, 0], sizes = [8, 8, 4], strides = [1, 1, 1]} : vector<10x10x4xf32> to vector<8x8x4xf32>
    %26 = vector.shape_cast %25 : vector<8x8x4xf32> to vector<64x4xf32>
    %c4 = arith.constant 4 : index
    %c0_15 = arith.constant 0 : index
    %c0_16 = arith.constant 0 : index
    %27 = vector.load %arg3[%c4, %c0_15, %c0_16] : memref<9x4x128xf32, #tpu.memory_space<vmem>>, vector<1x4x128xf32>
    %28 = vector.shape_cast %27 : vector<1x4x128xf32> to vector<4x128xf32>
    %cst_17 = arith.constant dense<0.000000e+00> : vector<64x128xf32>
    %29 = tpu.matmul %26, %28, %cst_17 {dimension_numbers = #tpu.dot_dimension_numbers<[1], [0], [0], [1], [0, 0, 1, 1], [], []>} : vector<64x4xf32>, vector<4x128xf32>, vector<64x128xf32> -> vector<64x128xf32>
    %30 = arith.addf %24, %29 : vector<64x128xf32>
    %31 = vector.extract_strided_slice %1 {offsets = [1, 2, 0], sizes = [8, 8, 4], strides = [1, 1, 1]} : vector<10x10x4xf32> to vector<8x8x4xf32>
    %32 = vector.shape_cast %31 : vector<8x8x4xf32> to vector<64x4xf32>
    %c5 = arith.constant 5 : index
    %c0_18 = arith.constant 0 : index
    %c0_19 = arith.constant 0 : index
    %33 = vector.load %arg3[%c5, %c0_18, %c0_19] : memref<9x4x128xf32, #tpu.memory_space<vmem>>, vector<1x4x128xf32>
    %34 = vector.shape_cast %33 : vector<1x4x128xf32> to vector<4x128xf32>
    %cst_20 = arith.constant dense<0.000000e+00> : vector<64x128xf32>
    %35 = tpu.matmul %32, %34, %cst_20 {dimension_numbers = #tpu.dot_dimension_numbers<[1], [0], [0], [1], [0, 0, 1, 1], [], []>} : vector<64x4xf32>, vector<4x128xf32>, vector<64x128xf32> -> vector<64x128xf32>
    %36 = arith.addf %30, %35 : vector<64x128xf32>
    %37 = vector.extract_strided_slice %1 {offsets = [2, 0, 0], sizes = [8, 8, 4], strides = [1, 1, 1]} : vector<10x10x4xf32> to vector<8x8x4xf32>
    %38 = vector.shape_cast %37 : vector<8x8x4xf32> to vector<64x4xf32>
    %c6 = arith.constant 6 : index
    %c0_21 = arith.constant 0 : index
    %c0_22 = arith.constant 0 : index
    %39 = vector.load %arg3[%c6, %c0_21, %c0_22] : memref<9x4x128xf32, #tpu.memory_space<vmem>>, vector<1x4x128xf32>
    %40 = vector.shape_cast %39 : vector<1x4x128xf32> to vector<4x128xf32>
    %cst_23 = arith.constant dense<0.000000e+00> : vector<64x128xf32>
    %41 = tpu.matmul %38, %40, %cst_23 {dimension_numbers = #tpu.dot_dimension_numbers<[1], [0], [0], [1], [0, 0, 1, 1], [], []>} : vector<64x4xf32>, vector<4x128xf32>, vector<64x128xf32> -> vector<64x128xf32>
    %42 = arith.addf %36, %41 : vector<64x128xf32>
    %43 = vector.extract_strided_slice %1 {offsets = [2, 1, 0], sizes = [8, 8, 4], strides = [1, 1, 1]} : vector<10x10x4xf32> to vector<8x8x4xf32>
    %44 = vector.shape_cast %43 : vector<8x8x4xf32> to vector<64x4xf32>
    %c7 = arith.constant 7 : index
    %c0_24 = arith.constant 0 : index
    %c0_25 = arith.constant 0 : index
    %45 = vector.load %arg3[%c7, %c0_24, %c0_25] : memref<9x4x128xf32, #tpu.memory_space<vmem>>, vector<1x4x128xf32>
    %46 = vector.shape_cast %45 : vector<1x4x128xf32> to vector<4x128xf32>
    %cst_26 = arith.constant dense<0.000000e+00> : vector<64x128xf32>
    %47 = tpu.matmul %44, %46, %cst_26 {dimension_numbers = #tpu.dot_dimension_numbers<[1], [0], [0], [1], [0, 0, 1, 1], [], []>} : vector<64x4xf32>, vector<4x128xf32>, vector<64x128xf32> -> vector<64x128xf32>
    %48 = arith.addf %42, %47 : vector<64x128xf32>
    %49 = vector.extract_strided_slice %1 {offsets = [2, 2, 0], sizes = [8, 8, 4], strides = [1, 1, 1]} : vector<10x10x4xf32> to vector<8x8x4xf32>
    %50 = vector.shape_cast %49 : vector<8x8x4xf32> to vector<64x4xf32>
    %c8 = arith.constant 8 : index
    %c0_27 = arith.constant 0 : index
    %c0_28 = arith.constant 0 : index
    %51 = vector.load %arg3[%c8, %c0_27, %c0_28] : memref<9x4x128xf32, #tpu.memory_space<vmem>>, vector<1x4x128xf32>
    %52 = vector.shape_cast %51 : vector<1x4x128xf32> to vector<4x128xf32>
    %cst_29 = arith.constant dense<0.000000e+00> : vector<64x128xf32>
    %53 = tpu.matmul %50, %52, %cst_29 {dimension_numbers = #tpu.dot_dimension_numbers<[1], [0], [0], [1], [0, 0, 1, 1], [], []>} : vector<64x4xf32>, vector<4x128xf32>, vector<64x128xf32> -> vector<64x128xf32>
    %54 = arith.addf %48, %53 : vector<64x128xf32>
    %c0_30 = arith.constant 0 : index
    %c0_31 = arith.constant 0 : index
    %c0_32 = arith.constant 0 : index
    %55 = vector.load %arg4[%c0_30, %c0_31, %c0_32] : memref<1x64x128xf32, #tpu.memory_space<vmem>>, vector<1x64x128xf32>
    %56 = vector.shape_cast %55 : vector<1x64x128xf32> to vector<64x128xf32>
    %57 = vector.shape_cast %54 : vector<64x128xf32> to vector<1x64x128xf32>
    tpu.vector_store %arg4[%c0_30, %c0_31, %c0_32], %57 {strides = array<i32>} : memref<1x64x128xf32, #tpu.memory_space<vmem>>, vector<1x64x128xf32>,
    %cst_33 = arith.constant dense<0.000000e+00> : vector<128xf32>
    %58 = vector.multi_reduction <add>, %54, %cst_33 [0] : vector<64x128xf32> to vector<128xf32>
    %59 = vector.shape_cast %58 : vector<128xf32> to vector<1x128xf32>
    %cst_34 = arith.constant 6.400000e+01 : f32
    %60 = vector.broadcast %cst_34 : f32 to vector<1x128xf32>
    %61 = arith.divf %59, %60 : vector<1x128xf32>
    %62 = vector.broadcast %61 : vector<1x128xf32> to vector<64x128xf32>
    %63 = arith.subf %54, %62 : vector<64x128xf32>
    %64 = arith.mulf %63, %63 : vector<64x128xf32>
    %cst_35 = arith.constant dense<0.000000e+00> : vector<128xf32>
    %65 = vector.multi_reduction <add>, %64, %cst_35 [0] : vector<64x128xf32> to vector<128xf32>
    %66 = vector.shape_cast %65 : vector<128xf32> to vector<1x128xf32>
    %c0_i32 = arith.constant 0 : i32
    %67 = arith.cmpi eq, %arg1, %c0_i32 : i32
    %68 = arith.extui %67 : i1 to i32
    %c0_i32_36 = arith.constant 0 : i32
    %69 = arith.cmpi ne, %68, %c0_i32_36 : i32
    scf.if %69 {
      %cst_52 = arith.constant 0.000000e+00 : f32
      %94 = vector.broadcast %cst_52 : f32 to vector<1x1x128xf32>
      %c0_53 = arith.constant 0 : index
      %c0_54 = arith.constant 0 : index
      %c0_55 = arith.constant 0 : index
      %95 = vector.load %arg5[%c0_53, %c0_54, %c0_55] : memref<1x1x128xf32, #tpu.memory_space<vmem>>, vector<1x1x128xf32>
      tpu.vector_store %arg5[%c0_53, %c0_54, %c0_55], %94 {strides = array<i32>} : memref<1x1x128xf32, #tpu.memory_space<vmem>>, vector<1x1x128xf32>,
      %cst_56 = arith.constant 0.000000e+00 : f32
      %96 = vector.broadcast %cst_56 : f32 to vector<1x1x128xf32>
      %c0_57 = arith.constant 0 : index
      %c0_58 = arith.constant 0 : index
      %c0_59 = arith.constant 0 : index
      %97 = vector.load %arg6[%c0_57, %c0_58, %c0_59] : memref<1x1x128xf32, #tpu.memory_space<vmem>>, vector<1x1x128xf32>
      tpu.vector_store %arg6[%c0_57, %c0_58, %c0_59], %96 {strides = array<i32>} : memref<1x1x128xf32, #tpu.memory_space<vmem>>, vector<1x1x128xf32>,
    } else {
    }
    %70 = arith.sitofp %arg1 : i32 to f32
    %cst_37 = arith.constant 1.000000e+00 : f32
    %71 = arith.addf %70, %cst_37 : f32
    %cst_38 = arith.constant 1.000000e+00 : f32
    %72 = arith.divf %cst_38, %71 : f32
    %c0_39 = arith.constant 0 : index
    %c0_40 = arith.constant 0 : index
    %c0_41 = arith.constant 0 : index
    %73 = vector.load %arg5[%c0_39, %c0_40, %c0_41] : memref<1x1x128xf32, #tpu.memory_space<vmem>>, vector<1x1x128xf32>
    %74 = vector.shape_cast %73 : vector<1x1x128xf32> to vector<1x128xf32>
    %c0_42 = arith.constant 0 : index
    %c0_43 = arith.constant 0 : index
    %c0_44 = arith.constant 0 : index
    %75 = vector.load %arg6[%c0_42, %c0_43, %c0_44] : memref<1x1x128xf32, #tpu.memory_space<vmem>>, vector<1x1x128xf32>
    %76 = vector.shape_cast %75 : vector<1x1x128xf32> to vector<1x128xf32>
    %77 = arith.subf %61, %74 : vector<1x128xf32>
    %78 = vector.broadcast %72 : f32 to vector<1x128xf32>
    %79 = arith.mulf %77, %78 : vector<1x128xf32>
    %80 = arith.addf %74, %79 : vector<1x128xf32>
    %c0_45 = arith.constant 0 : index
    %c0_46 = arith.constant 0 : index
    %c0_47 = arith.constant 0 : index
    %81 = vector.load %arg5[%c0_45, %c0_46, %c0_47] : memref<1x1x128xf32, #tpu.memory_space<vmem>>, vector<1x1x128xf32>
    %82 = vector.shape_cast %81 : vector<1x1x128xf32> to vector<1x128xf32>
    %83 = vector.shape_cast %80 : vector<1x128xf32> to vector<1x1x128xf32>
    tpu.vector_store %arg5[%c0_45, %c0_46, %c0_47], %83 {strides = array<i32>} : memref<1x1x128xf32, #tpu.memory_space<vmem>>, vector<1x1x128xf32>,
    %84 = arith.addf %76, %66 : vector<1x128xf32>
    %85 = arith.mulf %77, %77 : vector<1x128xf32>
    %cst_48 = arith.constant 6.400000e+01 : f32
    %86 = arith.mulf %cst_48, %70 : f32
    %87 = arith.mulf %86, %72 : f32
    %88 = vector.broadcast %87 : f32 to vector<1x128xf32>
    %89 = arith.mulf %85, %88 : vector<1x128xf32>
    %90 = arith.addf %84, %89 : vector<1x128xf32>
    %c0_49 = arith.constant 0 : index
    %c0_50 = arith.constant 0 : index
    %c0_51 = arith.constant 0 : index
    %91 = vector.load %arg6[%c0_49, %c0_50, %c0_51] : memref<1x1x128xf32, #tpu.memory_space<vmem>>, vector<1x1x128xf32>
    %92 = vector.shape_cast %91 : vector<1x1x128xf32> to vector<1x128xf32>
    %93 = vector.shape_cast %90 : vector<1x128xf32> to vector<1x1x128xf32>
    tpu.vector_store %arg6[%c0_49, %c0_50, %c0_51], %93 {strides = array<i32>} : memref<1x1x128xf32, #tpu.memory_space<vmem>>, vector<1x1x128xf32>,
    return
  }
  func.func @transform_0(%arg0: i32, %arg1: i32) -> (i32, i32, i32, i32) {
    %c1_i32 = arith.constant 1 : i32
    %0 = arith.muli %arg0, %c1_i32 : i32
    %1 = arith.addi %0, %arg1 : i32
    %c0_i32 = arith.constant 0 : i32
    %c0_i32_0 = arith.constant 0 : i32
    %c0_i32_1 = arith.constant 0 : i32
    %c0_i32_2 = arith.constant 0 : i32
    return %1, %c0_i32, %c0_i32_0, %c0_i32_1 : i32, i32, i32, i32
  }
  func.func @transform_1(%arg0: i32, %arg1: i32) -> (i32, i32, i32) {
    %c0_i32 = arith.constant 0 : i32
    %c0_i32_0 = arith.constant 0 : i32
    %c0_i32_1 = arith.constant 0 : i32
    %c0_i32_2 = arith.constant 0 : i32
    return %c0_i32, %c0_i32_0, %c0_i32_1 : i32, i32, i32
  }
  func.func @transform_2(%arg0: i32, %arg1: i32) -> (i32, i32, i32) {
    %c1_i32 = arith.constant 1 : i32
    %0 = arith.muli %arg0, %c1_i32 : i32
    %1 = arith.addi %0, %arg1 : i32
    %c0_i32 = arith.constant 0 : i32
    %c0_i32_0 = arith.constant 0 : i32
    %c0_i32_1 = arith.constant 0 : i32
    return %1, %c0_i32, %c0_i32_0 : i32, i32, i32
  }
  func.func @transform_3(%arg0: i32, %arg1: i32) -> (i32, i32, i32) {
    %c0_i32 = arith.constant 0 : i32
    %c0_i32_0 = arith.constant 0 : i32
    %c0_i32_1 = arith.constant 0 : i32
    return %arg0, %c0_i32, %c0_i32_0 : i32, i32, i32
  }
  func.func @transform_4(%arg0: i32, %arg1: i32) -> (i32, i32, i32) {
    %c0_i32 = arith.constant 0 : i32
    %c0_i32_0 = arith.constant 0 : i32
    %c0_i32_1 = arith.constant 0 : i32
    return %arg0, %c0_i32, %c0_i32_0 : i32, i32, i32
  }
}

</mosaic_0001>

<bundles_post_ra>
// kernel: tpu_custom_call.1
= control target key start
LH: loop header
LB: loop body
LE: loop exit
PB: predicated region body
PF: predicated region fallthrough
CT: control target
= control target key end

     0   :  { %10 = vsyncpa [#allocation3], 0  ;;  %s2855_s0 = inlined_call_operand.vmem [shape: f32[2,10,10,4], index: 0, kind: input, shape index: {}]   ;;  %s2856_s1 = inlined_call_operand.vmem [shape: f32[9,4,128], index: 1, kind: input, shape index: {}]   ;;  %s2857_s2 = inlined_call_operand.hbm [shape: f32[2,64,128], index: 2, kind: output, shape index: {0}]   ;;  %s2858_s3 = inlined_call_operand.hbm [shape: f32[2,1,128], index: 3, kind: output, shape index: {1}]   ;;  %s2859_s4 = inlined_call_operand.hbm [shape: f32[2,1,128], index: 4, kind: output, shape index: {2}]  }
   0x1   :  { %12 = vsyncpa [#allocation3 + $0x1], 0 }
   0x2   :  { %13 = vsyncpa [#allocation5], 0 }
   0x3   :  { %15 = vsyncpa [#allocation5 + $0x1], 0  ;;  %s2311_s15 = smov 0   ;;  %s2313_s16 = smov 0  }
   0x4   :  { %s2315_s17 = smov 0   ;;  %s2317_s18 = smov 0  }
   0x5   :  { %s2319_s19 = smov 0   ;;  %s2321_s20 = smov 0  }
   0x6 LB: > { %s1694_s21 = sadd.s32 4294967295, %s2278_s20   ;;  %s1695_s22 = sadd.s32 4294967294, %s2278_s20   ;;  %s2278_s20 = sphi %s2321_s20, %s21_s20   ;;  %s2274_s19 = sphi %s2319_s19, %s2866_s19   ;;  %s2270_s18 = sphi %s2317_s18, %s2865_s18   ;;  %s2266_s17 = sphi %s2315_s17, %s2864_s17   ;;  %s2262_s16 = sphi %s2313_s16, %s2863_s16   ;;  %s2258_s15 = sphi %s2311_s15, %s2862_s15  }
   0x7   : > { %s33_s23 = sadd.s32 1, %s2274_s19  ;;  %s91_s24 = sadd.s32 1, %s2266_s17 }
   0x8   : > { %p35_p0 = scmp.ge.s32.totalorder %s33_s23, 2  ;;  %p101_p1 = scmp.ne.s32.totalorder %s2266_s17, %s2262_s16 }
   0x9   : > { %p102_p2 = scmp.eq.s32.totalorder %s1694_s21, 1  ;;  %p107_p3 = scmp.ne.s32.totalorder %s2262_s16, %s2258_s15 }
   0xa   : > { %s2868_s23 = smov (%p35_p0, %s33_s23), 0  ;;  %p108_p5 = scmp.eq.s32.totalorder %s1695_s22, 1 }
   0xb   : > { %p2353_p4 = por %p102_p2, %p101_p1  ;;  %s88_s26 = ssub.s32 %s2274_s19, %s2868_s23 }
   0xc   : > { %p1698_p6 = scmp.ge.s32.totalorder %s2278_s20, 1  ;;  %p89_p7 = scmp.eq.s32.totalorder %s88_s26, 0 }
   0xd   : > { %p2362_p8 = por %p108_p5, %p107_p3  ;;  %p191_p9 = scmp.lt.s32.totalorder %s2278_s20, 3 }
   0xe   : > { %s2368_s28 = scalar_select %p89_p7, %s2266_s17, %s91_s24  }
   0xf   : > { %p192_p10 = pnand %p1698_p6, %p191_p9 }
  0x10   : > { %v1701_v0 = vld [vmem:[%s2856_s1 + $0x4] sm:$0xf] (!%p192_p10)  ;;  %vm315_vm0 = vcmask (!%p192_p10), 1043456   ;;  %v2376_v1 = vld [vmem:[%s2856_s1 + $0x10] sm:$0xf] (!%p192_p10)  ;;  %p227_p11 = scmp.lt.s32.totalorder (!%p192_p10), %s2270_s18, 1 }
  0x11   : > { %195 = sbr.rel (%p192_p10) target bundleno = 406 (0x196), region = 28  ;;  %1879 = vmatprep.subr.msk.mxu1 (!%p192_p10), %vm315_vm0, %v1701_v0  ;;  %1935 = vmatprep.subr.msk.mxu0 (!%p192_p10), %vm315_vm0, %v2376_v1  ;;  %v254_v2 = vld [vmem:[%s2856_s1] sm:$0xf] (!%p192_p10)  ;;  %v1750_v3 = vld [vmem:[%s2856_s1 + $0x14] sm:$0xf] (!%p192_p10)  ;;  %vm271_vm1 = vcmask (!%p192_p10), 1046528  }
  0x12   : > { %1880 = vmatpush3.msk.msra.mxu1 (!%p192_p10), %vm315_vm0, %v1701_v0  ;;  %1936 = vmatpush3.msk.msra.mxu0 (!%p192_p10), %vm315_vm0, %v2376_v1  ;;  %vm298_vm2 = vcmask (!%p192_p10), 31744   ;;  %v1760_v21 = vld [vmem:[%s2856_s1 + $0x18] sm:$0xf] (!%p192_p10)  ;;  %v2439_v28 = vld [vmem:[%s2856_s1 + $0x8] sm:$0xf] (!%p192_p10)  ;;  %vm548_vm3 = vcmask (!%p192_p10), 1045504  }
  0x13   : > { %1893 = vmatprep.subr.msk.mxu1 (!%p192_p10), %vm315_vm0, %v254_v2  ;;  %1949 = vmatprep.subr.msk.mxu0 (!%p192_p10), %vm315_vm0, %v1750_v3  ;;  %v1770_v58 = vld [vmem:[%s2856_s1 + $0x1c] sm:$0xf] (!%p192_p10)  ;;  %s1797_s29 = sshll.u32 (!%p192_p10), %s2270_s18, 10  ;;  %s2281_s10 = smov (!%p192_p10), [#allocation2]  }
  0x14   : > { %s2725_s7 = scalar_lea.hbm (!%p192_p10), %s2857_s2, %s1797_s29 }
  0x18   : > { %s228_s11 = scalar_select %p227_p11, %s2270_s18, 1 }
  0x1a   : > { %s2071_s12 = smul.u32 160, %s228_s11  ;;  %s2144_s11 = sshll.u32 %s2281_s10, 4  ;;  %s2145_s11 = int_to_ptr.vmem [resolvable:$false] %s2144_s11 }
  0x1c   : > { %s2397_s24 = scalar_lea.vmem %s2855_s0, %s2071_s12  ;;  %s2682_s12 = sand.u32 1, %s2262_s16  }
  0x1d   : > { %v2400_v4 = vld [vmem:[%s2397_s24] sm:$0xff]  ;;  %v2403_v5 = vld [vmem:[%s2397_s24 + $0x8] sm:$0x3]  ;;  %v2406_v6 = vld [vmem:[%s2397_s24 + $0x10] sm:$0xff]  ;;  %s2685_s13 = scalar_lea.vmem [#allocation4], %s2682_s12  ;;  %s2689_s14 = scalar_lea.vmem [#allocation6], %s2682_s12 }
  0x1e   : > { %v272_v7 = vrot.slane %v2400_v4, 1  ;;  %v273_v8 = vrot.slane %v2403_v5, 1  ;;  %v237_v9 = vld [vmem:[%s2397_s24 + $0x18] sm:$0x3]  ;;  %v275_v10 = vrot.slane %v2406_v6, 1  ;;  %v2413_v12 = vld [vmem:[%s2397_s24 + $0x20] sm:$0xff] }
  0x1f   : > { %v276_v11 = vrot.slane %v237_v9, 1  ;;  %v239_v13 = vld [vmem:[%s2397_s24 + $0x28] sm:$0x3]  ;;  %v2417_v14 = vld [vmem:[%s2397_s24 + $0x30] sm:$0xff]  ;;  %v553_v16 = vrot.slane %v237_v9, 2  ;;  %v278_v17 = vrot.slane %v2413_v12, 1 }
  0x20   : > { %v274_v15 = vsel %vm271_vm1, %v272_v7, %v273_v8  ;;  %v279_v18 = vrot.slane %v239_v13, 1  ;;  %v241_v19 = vld [vmem:[%s2397_s24 + $0x38] sm:$0x3]  ;;  %v2423_v20 = vld [vmem:[%s2397_s24 + $0x40] sm:$0xff]  ;;  %v281_v23 = vrot.slane %v2417_v14, 1  ;;  %v2434_v27 = vld [vmem:[%s2397_s24 + $0x50] sm:$0xff] }
  0x21   : > { %1881 = vmatprep.mubr.msk.f32.mxu1 %vm298_vm2, %v274_v15  ;;  %v277_v22 = vsel %vm271_vm1, %v275_v10, %v276_v11  ;;  %v282_v24 = vrot.slane %v241_v19, 1  ;;  %v243_v25 = vld [vmem:[%s2397_s24 + $0x48] sm:$0x3]  ;;  %v284_v26 = vrot.slane %v2423_v20, 1  ;;  %v552_v31 = vrot.slane %v2406_v6, 2  ;;  %v2449_v33 = vld [vmem:[%s2397_s24 + $0x60] sm:$0xff] }
  0x22   : > { %1937 = vmatprep.mubr.msk.f32.mxu0 %vm298_vm2, %v277_v22  ;;  %1882 = vmatmul.mubr.msk.f32.vlgmr.msra.gmra.mrb[0].mxu1 %vm298_vm2, %v277_v22  ;;  %v2444_v29 = vsel %vm271_vm1, %v278_v17, %v279_v18  ;;  %v285_v30 = vrot.slane %v243_v25, 1  ;;  %v245_v32 = vld [vmem:[%s2397_s24 + $0x58] sm:$0x3]  ;;  %v556_v34 = vrot.slane %v239_v13, 2  ;;  %v287_v36 = vrot.slane %v2434_v27, 1  ;;  %v2468_v43 = vld [vmem:[%s2397_s24 + $0x70] sm:$0xff] }
  0x23   : > { %1894 = vmatpush3.msk.msra.mxu1 %vm315_vm0, %v254_v2  ;;  %1938 = vmatmul.mubr.msk.f32.vlgmr.msra.gmra.mrb[0].mxu0 %vm298_vm2, %v2444_v29  ;;  %v2455_v35 = vsel %vm271_vm1, %v281_v23, %v282_v24  ;;  %v288_v37 = vrot.slane %v245_v32, 1  ;;  %v247_v38 = vld [vmem:[%s2397_s24 + $0x68] sm:$0x3]  ;;  %v555_v40 = vrot.slane %v2413_v12, 2  ;;  %v290_v41 = vrot.slane %v2449_v33, 1  ;;  %s1522_s8 = scalar_lea.sflag [#allocation3], %s2682_s12 }
  0x24   : > { %1950 = vmatpush3.msk.msra.mxu0 %vm315_vm0, %v1750_v3  ;;  %1884 = vmatprep.mubr.msk.f32.mxu1 %vm298_vm2, %v2444_v29  ;;  %v2463_v39 = vsel %vm271_vm1, %v284_v26, %v285_v30  ;;  %v291_v42 = vrot.slane %v247_v38, 1  ;;  %v249_v44 = vld [vmem:[%s2397_s24 + $0x78] sm:$0x3]  ;;  %v2474_v45 = vsel %vm548_vm3, %v552_v31, %v553_v16  ;;  %v558_v46 = vrot.slane %v2417_v14, 2  ;;  %v2527_v3 = vld [vmem:[%s2397_s24 + $0x80] sm:$0xff] }
  0x25   : > { %1940 = vmatprep.mubr.msk.f32.mxu0 %vm298_vm2, %v2455_v35  ;;  %1963 = vmatprep.subr.msk.mxu0 %vm315_vm0, %v1760_v21  ;;  %v559_v47 = vrot.slane %v241_v19, 2  ;;  %v2487_v48 = vsel %vm271_vm1, %v287_v36, %v288_v37  ;;  %v293_v49 = vrot.slane %v2468_v43, 1  ;;  %v294_v50 = vrot.slane %v249_v44, 1  ;;  %v2530_v7 = vld [vmem:[%s2397_s24 + $0x88] sm:$0x3] }
  0x26   : > { %1885 = vmatmul.mubr.msk.f32.gmra.mrb[2].mxu1 %vm298_vm2, %v2455_v35  ;;  %1907 = vmatprep.subr.msk.mxu1 %vm315_vm0, %v2439_v28  ;;  %v2493_v51 = vsel %vm548_vm3, %v555_v40, %v556_v34  ;;  %v2496_v52 = vsel %vm271_vm1, %v290_v41, %v291_v42  ;;  %v561_v53 = vrot.slane %v2423_v20, 2  ;;  %v562_v54 = vrot.slane %v243_v25, 2  ;;  %v1730_v13 = vld [vmem:[%s2856_s1 + $0xc] sm:$0xf]  ;;  %v1780_v18 = vld [vmem:[%s2856_s1 + $0x20] sm:$0xf] }
  0x27   : > { %1941 = vmatmul.mubr.msk.f32.gmra.mrb[2].mxu0 %vm298_vm2, %v2463_v39  ;;  %1887 = vmatprep.mubr.msk.f32.mxu1 %vm298_vm2, %v2463_v39  ;;  %v2500_v55 = vsel %vm548_vm3, %v558_v46, %v559_v47  ;;  %v564_v56 = vrot.slane %v2434_v27, 2  ;;  %v565_v57 = vrot.slane %v245_v32, 2  ;;  %v2513_v59 = vsel %vm271_vm1, %v293_v49, %v294_v50  ;;  %v253_v22 = vld [vmem:[%s2397_s24 + $0x98] sm:$0x3] }
  0x28   : > { %1951 = vmatprep.mubr.msk.f32.mxu0 %vm298_vm2, %v2474_v45  ;;  %v2519_v60 = vsel %vm548_vm3, %v561_v53, %v562_v54  ;;  %v567_v61 = vrot.slane %v2449_v33, 2  ;;  %v568_v62 = vrot.slane %v247_v38, 2  ;;  %v570_v0 = vrot.slane %v2468_v43, 2 }
  0x29   : > { %v2523_v63 = vsel %vm548_vm3, %v564_v56, %v565_v57  ;;  %v571_v2 = vrot.slane %v249_v44, 2  ;;  %v952_v9 = vrot.slane %v2527_v3, 2  ;;  %v953_v10 = vrot.slane %v2530_v7, 2 }
  0x2a   : > { %1888 = vmatmul.mubr.msk.f32.gmra.mrb[4].mxu1 %vm298_vm2, %v2487_v48  ;;  %v2542_v8 = vsel %vm548_vm3, %v567_v61, %v568_v62  ;;  %v550_v16 = vrot.slane %v2403_v5, 2  ;;  %v549_v17 = vrot.slane %v2400_v4, 2  ;;  %v252_v5 = vld [vmem:[%s2397_s24 + $0x90] sm:$0xff]  ;;  %v829_v19 = vrot.slane %v2527_v3, 1  ;;  %s1699_s24 = sshll.u32 %s2682_s12, 6 }
  0x2b   : > { %1952 = vmatmul.mubr.msk.f32.vlgmr.msra.gmra.mrb[0].mxu0 %vm298_vm2, %v2493_v51  ;;  %1890 = vmatprep.mubr.msk.f32.mxu1 %vm298_vm2, %v2496_v52  ;;  %v2547_v11 = vsel %vm548_vm3, %v570_v0, %v571_v2  ;;  %v2563_v15 = vsel %vm548_vm3, %v952_v9, %v953_v10  ;;  %v1197_v23 = vrot.slane %v252_v5, 1  ;;  %v1198_v24 = vrot.slane %v253_v22, 1  ;;  %s2697_s26 = scalar_lea.vmem [#allocation2], %s1699_s24  ;;  %s2146_s24 = scalar_lea.vmem %s2145_s11, 2048 }
  0x2c   : > { %1964 = vmatpush3.msk.msra.mxu0 %vm315_vm0, %v1760_v21  ;;  %1954 = vmatprep.mubr.msk.f32.mxu0 %vm298_vm2, %v2500_v55  ;;  %v830_v21 = vrot.slane %v2530_v7, 1  ;;  %s1544_s30 = sshll.u32 %s2697_s26, 4  ;;  %s2727_s30 = int_to_ptr.vmem [resolvable:$true] %s1544_s30 }
  0x2d   : > { %1977 = vmatprep.subr.msk.mxu0 %vm315_vm0, %v1770_v58  ;;  %s2140_s9 = scalar_lea.vmem %s2727_s30, 1024  ;;  %p2147_p1 = scmp.lt.s32.totalorder %s2727_s30, %s2145_s11 }
  0x2e   : > { %1891 = vmatmul.mubr.msk.f32.gmra.mrb[6].mxu1 %vm298_vm2, %v2513_v59  ;;  %v831_v25 = vsel %vm271_vm1, %v829_v19, %v830_v21  ;;  %p2141_p12 = scmp.ne.s32.totalorder %s2727_s30, %s2140_s9  ;;  %p2148_p2 = scmp.lt.s32.totalorder %s2146_s24, %s2140_s9 }
  0x2f   : > { %1955 = vmatmul.mubr.msk.f32.gmra.mrb[2].mxu0 %vm298_vm2, %v2519_v60  ;;  %1895 = vmatprep.mubr.msk.f32.mxu1 %vm298_vm2, %v2400_v4  ;;  %v551_v4 = vsel %vm548_vm3, %v549_v17, %v550_v16 }
  0x30   : > { %1957 = vmatprep.mubr.msk.f32.mxu0 %vm298_vm2, %v2523_v63  ;;  %p2142_p13 = pnand %p2141_p12, %p2353_p4  ;;  %p2149_p3 = por %p2148_p2, %p2147_p1 }
  0x32   : > { %1896 = vmatmul.mubr.msk.f32.vlgmr.msra.gmra.mrb[0].mxu1 %vm298_vm2, %v2406_v6  ;;  %p2143_p0 = pneg %p2142_p13 }
  0x33   : > { %1908 = vmatpush3.msk.msra.mxu1 %vm315_vm0, %v2439_v28  ;;  %1958 = vmatmul.mubr.msk.f32.gmra.mrb[4].mxu0 %vm298_vm2, %v2542_v8 }
  0x34   : > { %1898 = vmatprep.mubr.msk.f32.mxu1 %vm298_vm2, %v2413_v12  ;;  %1960 = vmatprep.mubr.msk.f32.mxu0 %vm298_vm2, %v2547_v11  ;;  %p2150_p5 = pnand %p2149_p3, %p2143_p0 }
  0x35   : > { %1921 = vmatprep.subr.msk.mxu1 %vm315_vm0, %v1730_v13 }
  0x36   : > { %1899 = vmatmul.mubr.msk.f32.gmra.mrb[2].mxu1 %vm298_vm2, %v2417_v14 }
  0x37   : > { %1961 = vmatmul.mubr.msk.f32.gmra.mrb[6].mxu0 %vm298_vm2, %v2563_v15  ;;  %1901 = vmatprep.mubr.msk.f32.mxu1 %vm298_vm2, %v2423_v20 }
  0x38   : > { %1965 = vmatprep.mubr.msk.f32.mxu0 %vm298_vm2, %v2413_v12 }
  0x3a   : > { %1902 = vmatmul.mubr.msk.f32.gmra.mrb[4].mxu1 %vm298_vm2, %v2434_v27 }
  0x3b   : > { %1966 = vmatmul.mubr.msk.f32.vlgmr.msra.gmra.mrb[0].mxu0 %vm298_vm2, %v2417_v14  ;;  %1904 = vmatprep.mubr.msk.f32.mxu1 %vm298_vm2, %v2449_v33 }
  0x3c   : > { %1978 = vmatpush3.msk.msra.mxu0 %vm315_vm0, %v1770_v58  ;;  %1968 = vmatprep.mubr.msk.f32.mxu0 %vm298_vm2, %v2423_v20 }
  0x3d   : > { %1991 = vmatprep.subr.msk.mxu0 %vm315_vm0, %v1780_v18 }
  0x3e   : > { %1905 = vmatmul.mubr.msk.f32.gmra.mrb[6].mxu1 %vm298_vm2, %v2468_v43 }
  0x3f   : > { %1969 = vmatmul.mubr.msk.f32.gmra.mrb[2].mxu0 %vm298_vm2, %v2434_v27  ;;  %1909 = vmatprep.mubr.msk.f32.mxu1 %vm298_vm2, %v551_v4 }
  0x40   : > { %1971 = vmatprep.mubr.msk.f32.mxu0 %vm298_vm2, %v2449_v33 }
  0x42   : > { %1910 = vmatmul.mubr.msk.f32.vlgmr.msra.gmra.mrb[0].mxu1 %vm298_vm2, %v2474_v45 }
  0x43   : > { %1922 = vmatpush3.msk.msra.mxu1 %vm315_vm0, %v1730_v13  ;;  %1972 = vmatmul.mubr.msk.f32.gmra.mrb[4].mxu0 %vm298_vm2, %v2468_v43 }
  0x44   : > { %1912 = vmatprep.mubr.msk.f32.mxu1 %vm298_vm2, %v2493_v51  ;;  %1974 = vmatprep.mubr.msk.f32.mxu0 %vm298_vm2, %v2527_v3 }
  0x45   : > { %2005 = vmatprep.subr.msk.mxu1 %vm315_vm0, %v2376_v1 }
  0x46   : > { %1913 = vmatmul.mubr.msk.f32.gmra.mrb[2].mxu1 %vm298_vm2, %v2500_v55 }
  0x47   : > { %1975 = vmatmul.mubr.msk.f32.gmra.mrb[6].mxu0 %vm298_vm2, %v252_v5  ;;  %1915 = vmatprep.mubr.msk.f32.mxu1 %vm298_vm2, %v2519_v60 }
  0x48   : > { %1979 = vmatprep.mubr.msk.f32.mxu0 %vm298_vm2, %v2444_v29 }
  0x4a   : > { %1916 = vmatmul.mubr.msk.f32.gmra.mrb[4].mxu1 %vm298_vm2, %v2523_v63 }
  0x4b   : > { %1980 = vmatmul.mubr.msk.f32.vlgmr.msra.gmra.mrb[0].mxu0 %vm298_vm2, %v2455_v35  ;;  %1918 = vmatprep.mubr.msk.f32.mxu1 %vm298_vm2, %v2542_v8 }
  0x4c   : > { %1992 = vmatpush3.msk.msra.mxu0 %vm315_vm0, %v1780_v18  ;;  %1982 = vmatprep.mubr.msk.f32.mxu0 %vm298_vm2, %v2463_v39 }
  0x4e   : > { %1919 = vmatmul.mubr.msk.f32.gmra.mrb[6].mxu1 %vm298_vm2, %v2547_v11 }
  0x4f   : > { %1983 = vmatmul.mubr.msk.f32.gmra.mrb[2].mxu0 %vm298_vm2, %v2487_v48  ;;  %1923 = vmatprep.mubr.msk.f32.mxu1 %vm298_vm2, %v2406_v6  ;;  %v1199_v6 = vsel %vm271_vm1, %v1197_v23, %v1198_v24 }
  0x50   : > { %1985 = vmatprep.mubr.msk.f32.mxu0 %vm298_vm2, %v2496_v52 }
  0x52   : > { %1924 = vmatmul.mubr.msk.f32.vlgmr.msra.gmra.mrb[0].mxu1 %vm298_vm2, %v2413_v12  ;;  %v1321_v12 = vrot.slane %v253_v22, 2 }
  0x53   : > { %2006 = vmatpush3.msk.msra.mxu1 %vm315_vm0, %v2376_v1  ;;  %1986 = vmatmul.mubr.msk.f32.gmra.mrb[4].mxu0 %vm298_vm2, %v2513_v59  ;;  %v1320_v1 = vrot.slane %v252_v5, 2 }
  0x54   : > { %1926 = vmatprep.mubr.msk.f32.mxu1 %vm298_vm2, %v2417_v14  ;;  %1988 = vmatprep.mubr.msk.f32.mxu0 %vm298_vm2, %v831_v25 }
  0x55   : > { %v1322_v14 = vsel %vm548_vm3, %v1320_v1, %v1321_v12 }
  0x56   : > { %1927 = vmatmul.mubr.msk.f32.gmra.mrb[2].mxu1 %vm298_vm2, %v2423_v20  ;;  %v2280_v20 = vmov 0.0  }
  0x57   : > { %1989 = vmatmul.mubr.msk.f32.gmra.mrb[6].mxu0 %vm298_vm2, %v1199_v6  ;;  %1929 = vmatprep.mubr.msk.f32.mxu1 %vm298_vm2, %v2434_v27  ;;  %1499 = vst [vmem:[%s2685_s13] sm:$0x1] %v2280_v20  ;;  %1500 = vst [vmem:[%s2689_s14] sm:$0x1] %v2280_v20 }
  0x58   : > { %1993 = vmatprep.mubr.msk.f32.mxu0 %vm298_vm2, %v2493_v51 }
  0x5a   : > { %1930 = vmatmul.mubr.msk.f32.gmra.mrb[4].mxu1 %vm298_vm2, %v2449_v33 }
  0x5b   : > { %1994 = vmatmul.mubr.msk.f32.vlgmr.msra.gmra.mrb[0].mxu0 %vm298_vm2, %v2500_v55  ;;  %1932 = vmatprep.mubr.msk.f32.mxu1 %vm298_vm2, %v2468_v43 }
  0x5c   : > { %1996 = vmatprep.mubr.msk.f32.mxu0 %vm298_vm2, %v2519_v60 }
  0x5e   : > { %1933 = vmatmul.mubr.msk.f32.gmra.mrb[6].mxu1 %vm298_vm2, %v2527_v3 }
  0x5f   : > { %1997 = vmatmul.mubr.msk.f32.gmra.mrb[2].mxu0 %vm298_vm2, %v2523_v63  ;;  %1943 = vmatprep.mubr.msk.f32.mxu1 %vm298_vm2, %v2487_v48 }
  0x60   : > { %1999 = vmatprep.mubr.msk.f32.mxu0 %vm298_vm2, %v2542_v8 }
  0x62   : > { %1944 = vmatmul.mubr.msk.f32.vlgmr.msra.gmra.mrb[4].mxu1 %vm298_vm2, %v2496_v52 }
  0x63   : > { %2000 = vmatmul.mubr.msk.f32.gmra.mrb[4].mxu0 %vm298_vm2, %v2547_v11  ;;  %1946 = vmatprep.mubr.msk.f32.mxu1 %vm298_vm2, %v2513_v59 }
  0x64   : > { %2002 = vmatprep.mubr.msk.f32.mxu0 %vm298_vm2, %v2563_v15 }
  0x66   : > { %1947 = vmatmul.mubr.msk.f32.gmra.mrb[6].mxu1 %vm298_vm2, %v831_v25 }
  0x67   : > { %2003 = vmatmul.mubr.msk.f32.gmra.mrb[6].mxu0 %vm298_vm2, %v1322_v14 }
 0x125   : > { %v1925_v26 = vpop.f32.mrb[0].mxu1 }
 0x126   : > { %v781_v27 = vpop.f32.mrb[1].mxu1 }
 0x129   : > { %v1928_v28 = vpop.f32.mrb[2].mxu1 }
 0x12a   : > { %v791_v29 = vpop.f32.mrb[3].mxu1 }
 0x12e   : > { %v1995_v30 = vpop.f32.mrb[0].mxu0 }
 0x12f   : > { %v2693_v31 = vadd.f32 %v1995_v30, %v1925_v26  ;;  %v1396_v32 = vpop.f32.mrb[1].mxu0 }
 0x130   : > { %v2695_v33 = vadd.f32 %v1396_v32, %v781_v27 }
 0x131   : > { %1444 = vst [vmem:[%s2697_s26 + $0x8] sm:$0xff] %v2693_v31 }
 0x132   : > { %1443 = vst [vmem:[%s2697_s26] sm:$0xff] %v2695_v33  ;;  %v1451_v34 = vadd.f32 %v2695_v33, %v2693_v31  ;;  %v1998_v35 = vpop.f32.mrb[2].mxu0 }
 0x133   : > { %v2705_v36 = vadd.f32 %v1998_v35, %v1928_v28  ;;  %v1406_v37 = vpop.f32.mrb[3].mxu0 }
 0x134   : > { %v2707_v38 = vadd.f32 %v1406_v37, %v791_v29 }
 0x135   : > { %1446 = vst [vmem:[%s2697_s26 + $0x18] sm:$0xff] %v2705_v36  ;;  %v1945_v39 = vpop.f32.mrb[4].mxu1 }
 0x136   : > { %1445 = vst [vmem:[%s2697_s26 + $0x10] sm:$0xff] %v2707_v38  ;;  %v1452_v40 = vadd.f32 %v2707_v38, %v1451_v34  ;;  %v2001_v41 = vpop.f32.mrb[4].mxu0  ;;  %v925_v42 = vpop.f32.mrb[5].mxu1 }
 0x137   : > { %v2714_v43 = vadd.f32 %v2001_v41, %v1945_v39  ;;  %v1416_v44 = vpop.f32.mrb[5].mxu0 }
 0x138   : > { %v2012_v45 = vadd.f32 %v1416_v44, %v925_v42  ;;  %v1453_v46 = vadd.f32 %v2705_v36, %v1452_v40 }
 0x139   : > { %1448 = vst [vmem:[%s2697_s26 + $0x28] sm:$0xff] %v2714_v43  ;;  %v1948_v47 = vpop.f32.mrb[6].mxu1 }
 0x13a   : > { %1447 = vst [vmem:[%s2697_s26 + $0x20] sm:$0xff] %v2012_v45  ;;  %v1454_v48 = vadd.f32 %v2012_v45, %v1453_v46  ;;  %v2004_v49 = vpop.f32.mrb[6].mxu0  ;;  %v935_v50 = vpop.f32.mrb[7].mxu1 }
 0x13b   : > { %v2013_v51 = vadd.f32 %v2004_v49, %v1948_v47  ;;  %v1426_v52 = vpop.f32.mrb[7].mxu0 }
 0x13c   : > { %v2014_v53 = vadd.f32 %v1426_v52, %v935_v50  ;;  %v1455_v54 = vadd.f32 %v2714_v43, %v1454_v48 }
 0x13d   : > { %1450 = vst [vmem:[%s2697_s26 + $0x38] sm:$0xff] %v2013_v51 }
 0x13e   : > { %1449 = vst [vmem:[%s2697_s26 + $0x30] sm:$0xff] %v2014_v53  ;;  %v1456_v55 = vadd.f32 %v2014_v53, %v1455_v54 }
 0x13f   : > { %2153 = shalt.err (!%p2150_p5)
}
 0x140   : > { %s2154_s26 = scalar_lea.hbm %s2725_s7, 1024  ;;  %s2158_s6 = scalar_lea.hbm %s2857_s2, 2048 }
 0x141   : > { %p2155_p6 = scmp.ne.s32.totalorder %s2725_s7, %s2154_s26  ;;  %p2159_p10 = scmp.lt.u32.totalorder %s2725_s7, %s2857_s2 }
 0x142   : > { %p2160_p11 = scmp.lt.u32.totalorder %s2158_s6, %s2154_s26  ;;  %p2162_p13 = scmp.lt.u32.totalorder %s2154_s26, %s2725_s7 }
 0x143   : > { %p2156_p7 = pnand %p2155_p6, %p2353_p4 }
 0x144   : > { %p2161_p12 = por %p2160_p11, %p2159_p10 }
 0x145   : > { %p2157_p9 = pneg %p2156_p7 }
 0x146   : > { %p2163_p0 = por %p2162_p13, %p2161_p12 }
 0x148   : > { %p2164_p1 = pnand %p2163_p0, %p2157_p9 }
 0x14a   : > { %2167 = shalt.err (!%p2164_p1)
}
 0x14b   : > { %s2282_s9 = smov 128   ;;  %s2283_s24 = smov 8   ;;  %v1457_v56 = vadd.f32 %v2013_v51, %v1456_v55  ;;  %v1506_v13 = vld [vmem:[%s2685_s13] sm:$0x1] }
 0x14c   : > { %2072 = dma.vmem_to_hbm [thread:$0]  (%p2353_p4), %s2727_s30, 1024, %s2725_s7, %s1522_s8, %s2282_s9, %s2282_s9, %s2283_s24  }
 0x14d   : > { %v1458_v57 = vrot.slane %v1457_v56, 4  ;;  %s2764_s12 = sand.u32 1, %s1694_s21   ;;  %s1793_s30 = sshll.u32 %s2270_s18, 4 }
 0x14e   : > { %s1560_s7 = sshll.u32 %s2685_s13, 4  ;;  %s2773_s29 = scalar_lea.hbm %s2858_s3, %s1793_s30  ;;  %s2775_s7 = int_to_ptr.vmem [resolvable:$true] %s1560_s7 }
 0x14f   : > { %v1459_v58 = vadd.f32 %v1458_v57, %v1457_v56  ;;  %s1527_s21 = scalar_lea.sflag [#allocation5], %s2764_s12  ;;  %s2168_s5 = scalar_lea.vmem %s2775_s7, 16 }
 0x150   : > { %p2169_p2 = scmp.ne.s32.totalorder %s2775_s7, %s2168_s5  ;;  %s2284_s6 = smov [#allocation4]  }
 0x151   : > { %v1460_v59 = vrot.slane %v1459_v58, 2  ;;  %s2172_s10 = sshll.u32 %s2284_s6, 4  ;;  %s2173_s10 = int_to_ptr.vmem [resolvable:$false] %s2172_s10 }
 0x152   : > { %p2170_p3 = pnand %p2169_p2, %p2353_p4  ;;  %s2174_s11 = scalar_lea.vmem %s2173_s10, 32 }
 0x153   : > { %v1461_v60 = vadd.f32 %v1460_v59, %v1459_v58  ;;  %p2175_p6 = scmp.lt.s32.totalorder %s2775_s7, %s2173_s10  ;;  %p2176_p7 = scmp.lt.s32.totalorder %s2174_s11, %s2168_s5 }
 0x154   : > { %p2171_p5 = pneg %p2170_p3 }
 0x155   : > { %v1462_v61 = vrot.slane %v1461_v60, 1  ;;  %p2177_p9 = por %p2176_p7, %p2175_p6 }
 0x157   : > { %v1463_v62 = vadd.f32 %v1462_v61, %v1461_v60  ;;  %p2178_p10 = pnand %p2177_p9, %p2171_p5 }
 0x159   : > { %v1465_v63 = vmul.f32 0.015625, %v1463_v62 }
 0x15b   : > { %v1466_v0 = vsub.f32 %v2695_v33, %v1465_v63  ;;  %v1467_v2 = vsub.f32 %v2693_v31, %v1465_v63  ;;  %v1468_v3 = vsub.f32 %v2707_v38, %v1465_v63  ;;  %v1469_v7 = vsub.f32 %v2705_v36, %v1465_v63 }
 0x15c   : > { %v1470_v8 = vsub.f32 %v2012_v45, %v1465_v63  ;;  %v1471_v9 = vsub.f32 %v2714_v43, %v1465_v63  ;;  %v1472_v10 = vsub.f32 %v2014_v53, %v1465_v63  ;;  %v1473_v11 = vsub.f32 %v2013_v51, %v1465_v63 }
 0x15d   : > { %v1474_v15 = vmul.f32 %v1466_v0, %v1466_v0  ;;  %v1475_v16 = vmul.f32 %v1467_v2, %v1467_v2  ;;  %v1476_v17 = vmul.f32 %v1468_v3, %v1468_v3  ;;  %v1508_v4 = vsub.f32 %v1465_v63, %v1506_v13 }
 0x15e   : > { %v1477_v5 = vmul.f32 %v1469_v7, %v1469_v7  ;;  %v1478_v22 = vmul.f32 %v1470_v8, %v1470_v8 }
 0x15f   : > { %v1482_v18 = vadd.f32 %v1475_v16, %v1474_v15  ;;  %v1511_v21 = vadd.f32 %v1508_v4, %v1506_v13 }
 0x161   : > { %v1483_v19 = vadd.f32 %v1482_v18, %v1476_v17  ;;  %1512 = vst [vmem:[%s2685_s13] sm:$0x1] %v1511_v21 }
 0x163   : > { %v1484_v23 = vadd.f32 %v1483_v19, %v1477_v5 }
 0x164   : > { %2181 = shalt.err (!%p2178_p10)
}
 0x165   : > { %s2182_s13 = scalar_lea.hbm %s2773_s29, 16  ;;  %s2186_s8 = scalar_lea.hbm %s2858_s3, 32 }
 0x166   : > { %p2183_p11 = scmp.ne.s32.totalorder %s2773_s29, %s2182_s13  ;;  %p2187_p0 = scmp.lt.u32.totalorder %s2773_s29, %s2858_s3 }
 0x167   : > { %p2188_p1 = scmp.lt.u32.totalorder %s2186_s8, %s2182_s13  ;;  %p2190_p3 = scmp.lt.u32.totalorder %s2182_s13, %s2773_s29 }
 0x168   : > { %p2184_p12 = pnand %p2183_p11, %p2353_p4 }
 0x169   : > { %p2189_p2 = por %p2188_p1, %p2187_p0 }
 0x16a   : > { %p2185_p13 = pneg %p2184_p12 }
 0x16b   : > { %p2191_p5 = por %p2190_p3, %p2189_p2 }
 0x16d   : > { %p2192_p6 = pnand %p2191_p5, %p2185_p13 }
 0x16f   : > { %2195 = shalt.err (!%p2192_p6)
}
 0x170   : > { %2073 = dma.vmem_to_hbm [thread:$0]  (%p2353_p4), %s2775_s7, 16, %s2773_s29, %s1527_s21   ;;  %v1479_v24 = vmul.f32 %v1471_v9, %v1471_v9  ;;  %v1485_v25 = vadd.f32 %v1484_v23, %v1478_v22  ;;  %v1480_v6 = vmul.f32 %v1472_v10, %v1472_v10  ;;  %v1481_v12 = vmul.f32 %v1473_v11, %v1473_v11  ;;  %v1507_v32 = vld [vmem:[%s2689_s14] sm:$0x1] }
 0x171   : > { %v1514_v30 = vmul.f32 %v1508_v4, %v1508_v4  ;;  %s1573_s7 = sshll.u32 %s2689_s14, 4  ;;  %s2809_s10 = scalar_lea.hbm %s2859_s4, %s1793_s30  ;;  %s1574_s7 = int_to_ptr.vmem [resolvable:$true] %s1573_s7 }
 0x172   : > { %v1486_v1 = vadd.f32 %v1485_v25, %v1479_v24  ;;  %s2196_s11 = scalar_lea.vmem %s1574_s7, 16  ;;  %s2285_s13 = smov [#allocation6]  }
 0x173   : > { %v1518_v34 = vmul.f32 0.0, %v1514_v30  ;;  %p2197_p7 = scmp.ne.s32.totalorder %s1574_s7, %s2196_s11  ;;  %s2200_s9 = sshll.u32 %s2285_s13, 4  ;;  %s2201_s9 = int_to_ptr.vmem [resolvable:$false] %s2200_s9 }
 0x174   : > { %v1487_v14 = vadd.f32 %v1486_v1, %v1480_v6  ;;  %s2202_s24 = scalar_lea.vmem %s2201_s9, 32  ;;  %p2203_p11 = scmp.lt.s32.totalorder %s1574_s7, %s2201_s9 }
 0x175   : > { %p2198_p9 = pnand %p2197_p7, %p2353_p4  ;;  %p2204_p12 = scmp.lt.s32.totalorder %s2202_s24, %s2196_s11 }
 0x176   : > { %v1488_v20 = vadd.f32 %v1487_v14, %v1481_v12 }
 0x177   : > { %p2199_p10 = pneg %p2198_p9  ;;  %p2205_p13 = por %p2204_p12, %p2203_p11 }
 0x178   : > { %v1489_v26 = vrot.slane %v1488_v20, 4 }
 0x179   : > { %p2206_p0 = pnand %p2205_p13, %p2199_p10 }
 0x17a   : > { %v1490_v27 = vadd.f32 %v1489_v26, %v1488_v20 }
 0x17c   : > { %v1491_v28 = vrot.slane %v1490_v27, 2 }
 0x17e   : > { %v1492_v29 = vadd.f32 %v1491_v28, %v1490_v27 }
 0x180   : > { %v1493_v31 = vrot.slane %v1492_v29, 1 }
 0x182   : > { %v1494_v33 = vadd.f32 %v1493_v31, %v1492_v29 }
 0x184   : > { %v1513_v35 = vadd.f32 %v1507_v32, %v1494_v33 }
 0x186   : > { %v1519_v36 = vadd.f32 %v1518_v34, %v1513_v35 }
 0x188   : > { %1520 = vst [vmem:[%s2689_s14] sm:$0x1] %v1519_v36 }
 0x189   : > { %2209 = shalt.err (!%p2206_p0)
}
 0x18a   : > { %s2210_s18 = scalar_lea.hbm %s2809_s10, 16  ;;  %s2214_s8 = scalar_lea.hbm %s2859_s4, 32 }
 0x18b   : > { %p2211_p1 = scmp.ne.s32.totalorder %s2809_s10, %s2210_s18  ;;  %p2215_p5 = scmp.lt.u32.totalorder %s2809_s10, %s2859_s4 }
 0x18c   : > { %p2216_p6 = scmp.lt.u32.totalorder %s2214_s8, %s2210_s18  ;;  %p2218_p9 = scmp.lt.u32.totalorder %s2210_s18, %s2809_s10 }
 0x18d   : > { %p2212_p2 = pnand %p2211_p1, %p2353_p4 }
 0x18e   : > { %p2217_p7 = por %p2216_p6, %p2215_p5 }
 0x18f   : > { %p2213_p3 = pneg %p2212_p2 }
 0x190   : > { %p2219_p10 = por %p2218_p9, %p2217_p7 }
 0x192   : > { %p2220_p11 = pnand %p2219_p10, %p2213_p3 }
 0x194   : > { %2223 = shalt.err (!%p2220_p11)
}
 0x195   : > { %2074 = dma.vmem_to_hbm [thread:$0]  (%p2353_p4), %s1574_s7, 16, %s2809_s10, %s1527_s21  }
 0x196 PF: > { %p2088_p12 = scmp.ge.s32.totalorder %s2278_s20, 2  ;;  %s1585_s29 = sand.u32 1, %s2258_s15  }
 0x197   : > { %s1586_s5 = scalar_lea.sflag [#allocation3], %s1585_s29 }
 0x198   : > { %p2079_p13 = pnand %p2088_p12, %p2362_p8 }
 0x19a   : > { %2249 = dma.done.wait (!%p2079_p13), %s1586_s5, 1024  }
 0x19b   : > { %2251 = vsyncadd (!%p2079_p13), %s1586_s5, 4294966272  ;;  %s1594_s11 = sand.u32 1, %s1695_s22  }
 0x19c   : > { %s1595_s13 = scalar_lea.sflag [#allocation5], %s1594_s11 }
 0x19d   : > { %2253 = dma.done.wait (!%p2079_p13), %s1595_s13, 32  }
 0x19e   : > { %2255 = vsyncadd (!%p2079_p13), %s1595_s13, 4294967264  ;;  %s21_s20 = sadd.s32 1, %s2278_s20   ;;  %s2862_s15 = smov %s2262_s16 }
 0x19f   : > { %p18_p4 = scmp.ge.s32.totalorder %s21_s20, 4   ;;  %s2863_s16 = smov %s2266_s17 }
 0x1a0   : > { %s2864_s17 = smov %s2368_s28  ;;  %s2865_s18 = smov %s2274_s19 }
 0x1a1   : > { %s2866_s19 = smov %s2868_s23  ;;  %20 = sbr.rel (!%p18_p4) target bundleno = 6 (0x6), region = 107 }
 0x1a8   :  { %1607 = vsyncpa [#allocation3], 1 }
 0x1a9   :  { %1609 = vsyncpa [#allocation3 + $0x1], 1 }
 0x1aa   :  { %1610 = vsyncpa [#allocation5], 1 }
 0x1ab   :  { %1612 = vsyncpa [#allocation5 + $0x1], 1 }

</bundles_post_ra>
